<compile_context>
chip_gen: v6e
topology: v6e:2x2x1
jax: 0.10.0
libtpu: 0.0.40
codegen_flags: <defaults>
</compile_context>

<pallas_src>
import jax
import jax.numpy as jnp
from jax import lax
from jax.experimental import pallas as pl
from jax.experimental.pallas import tpu as pltpu


def _round_up(a: int, b: int) -> int:
    return ((a + b - 1) // b) * b


def _encoder_lin2_kernel(g_ref, x_ref, v_ref, b_ref, o_ref):
    """Fused weight-norm linear:  o = (x @ v.T) * (g / ||v||_F) + bias."""
    v = v_ref[...]
    # weight_norm(dim=None) => scalar g and Frobenius norm over all of v.
    # Always reduce in f32 regardless of the storage dtype of v.
    vf = v.astype(jnp.float32)
    scale = g_ref[0, 0] * lax.rsqrt(jnp.sum(vf * vf))
    # x:[bm,K] . v:[Np,K] contracted over K -> [bm,Np]; MXU, f32 accumulation.
    acc = lax.dot_general(
        x_ref[...], v,
        dimension_numbers=(((1,), (1,)), ((), ())),
        preferred_element_type=jnp.float32)
    bias = b_ref[...].astype(jnp.float32)
    o_ref[...] = (acc * scale + bias).astype(o_ref.dtype)


@jax.jit
def encoder_forward(x, v, g, bias):
    """Encoder.forward == lin2 (weight_norm(dim=None) Linear, no activation).

    x    : [M, K]  input             (K = input_size)
    v    : [N, K]  weight_norm "v"   (N = state_size)  -- PyTorch Linear layout
    g    : []      weight_norm "g"   (dim=None => scalar g, Frobenius norm)
    bias : [N]
    """
    M, K = x.shape
    N = v.shape[0]

    # Lane-dense output: pad state_size to a multiple of 128.  Padded rows of
    # v are zero, so the in-kernel Frobenius norm is unchanged.
    n_pad = _round_up(N, 128)
    # Batch tiling: one block at small M; up to 512-row "parallel" blocks at
    # large M (512-wide tiles keep the auto-pipeline near the HBM roofline
    # while staying far below the VMEM limit at these K / N sizes).
    block_m = min(_round_up(M, 8), 512)
    m_pad = _round_up(M, block_m)

    # These pads touch only weights / a tiny activation edge; with static
    # weights they are cacheable and fuse under jit with the pallas_call.
    xp = x if m_pad == M else jnp.pad(x, ((0, m_pad - M), (0, 0)))
    vp = v if n_pad == N else jnp.pad(v, ((0, n_pad - N), (0, 0)))
    bp = (bias if n_pad == N else jnp.pad(bias, (0, n_pad - N))).reshape(1, n_pad)
    g2 = jnp.asarray(g, jnp.float32).reshape(1, 1)

    out = pl.pallas_call(
        _encoder_lin2_kernel,
        out_shape=jax.ShapeDtypeStruct((m_pad, n_pad), x.dtype),
        grid=(m_pad // block_m,),
        in_specs=[
            pl.BlockSpec(memory_space=pltpu.MemorySpace.SMEM),  # g (scalar)
            pl.BlockSpec((block_m, K), lambda i: (i, 0)),       # x tile
            pl.BlockSpec((n_pad, K), lambda i: (0, 0)),         # v (VMEM-resident)
            pl.BlockSpec((1, n_pad), lambda i: (0, 0)),         # bias (resident)
        ],
        out_specs=pl.BlockSpec((block_m, n_pad), lambda i: (i, 0)),
        compiler_params=pltpu.CompilerParams(
            dimension_semantics=("parallel",)),
    )(g2, xp, vp, bp)

    return out[:M, :N]


if __name__ == "__main__":
    # Encoder(input_size=32, state_size=64, num_layers=2), batch of 16.
    M, input_size, state_size = 16, 32, 64

    key = jax.random.PRNGKey(0)
    kx, kv, kg, kb = jax.random.split(key, 4)

    x = jax.random.normal(kx, (M, input_size), dtype=jnp.float32)
    # Deterministic synthetic parameters for lin2 (weight_norm Linear).
    v = jax.random.normal(kv, (state_size, input_size), dtype=jnp.float32) * 0.1
    g = jnp.abs(jax.random.normal(kg, (), dtype=jnp.float32)) + 1.0
    bias = jax.random.normal(kb, (state_size,), dtype=jnp.float32) * 0.01

    out = jax.block_until_ready(encoder_forward(x, v, g, bias))

    # Reference: PyTorch weight_norm(dim=None) Linear math in plain JAX.
    w_ref = g * v / jnp.sqrt(jnp.sum(v * v))
    ref = x @ w_ref.T + bias
    assert out.shape == (M, state_size)
    assert jnp.allclose(out, ref, atol=1e-5, rtol=1e-5), float(
        jnp.max(jnp.abs(out - ref)))

    # bf16 MXU-feed path (operands bf16, in-kernel f32 accumulation/scale/bias).
    out_bf16 = jax.block_until_ready(
        encoder_forward(x.astype(jnp.bfloat16), v.astype(jnp.bfloat16), g,
                        bias.astype(jnp.bfloat16)))
    assert out_bf16.shape == (M, state_size)
    assert jnp.allclose(out_bf16.astype(jnp.float32), ref, atol=5e-2, rtol=5e-2)

    # Larger batch exercises the multi-tile "parallel" grid path.
    xL = jax.random.normal(kx, (1024, input_size), dtype=jnp.float32)
    outL = jax.block_until_ready(encoder_forward(xL, v, g, bias))
    refL = xL @ w_ref.T + bias
    assert outL.shape == (1024, state_size)
    assert jnp.allclose(outL, refL, atol=1e-5, rtol=1e-5)

    print("KERNEL_OK")
</pallas_src>

<mosaic_0001>
module attributes {stable_mosaic.version = 11 : i64} {
  func.func @_encoder_lin2_kernel(%arg0: i32, %arg1: memref<1x1xf32, #tpu.memory_space<smem>>, %arg2: memref<16x32xf32, #tpu.memory_space<vmem>>, %arg3: memref<128x32xf32, #tpu.memory_space<vmem>>, %arg4: memref<1x128xf32, #tpu.memory_space<vmem>>, %arg5: memref<16x128xf32, #tpu.memory_space<vmem>>) attributes {dimension_semantics = [#tpu.dimension_semantics<parallel>], iteration_bounds = array<i64: 1>, scalar_prefetch = 0 : i64, scratch_operands = 0 : i64, tpu.core_type = #tpu.core_type<tc>, window_params = [{transform_indices = @transform_0, window_bounds = array<i64: 1, 1>}, {transform_indices = @transform_1, window_bounds = array<i64: 16, 32>}, {pipeline_mode = #tpu.pipeline_mode<synchronous>, transform_indices = @transform_2, window_bounds = array<i64: 128, 32>}, {pipeline_mode = #tpu.pipeline_mode<synchronous>, transform_indices = @transform_3, window_bounds = array<i64: 1, 128>}, {transform_indices = @transform_4, window_bounds = array<i64: 16, 128>}]} {
    %c0 = arith.constant 0 : index
    %c0_0 = arith.constant 0 : index
    %0 = vector.load %arg3[%c0, %c0_0] : memref<128x32xf32, #tpu.memory_space<vmem>>, vector<128x32xf32>
    %c0_1 = arith.constant 0 : index
    %c0_2 = arith.constant 0 : index
    %1 = memref.load %arg1[%c0_1, %c0_2] : memref<1x1xf32, #tpu.memory_space<smem>>
    %2 = arith.mulf %0, %0 : vector<128x32xf32>
    %3 = vector.shape_cast %2 : vector<128x32xf32> to vector<1x128x32xf32>
    %cst = arith.constant dense<0.000000e+00> : vector<1xf32>
    %4 = vector.multi_reduction <add>, %3, %cst [1, 2] : vector<1x128x32xf32> to vector<1xf32>
    %5 = vector.shape_cast %4 : vector<1xf32> to vector<1x1x1xf32>
    %6 = vector.extract %5[0, 0, 0] : f32 from vector<1x1x1xf32>
    %7 = math.rsqrt %6 : f32
    %8 = arith.mulf %1, %7 : f32
    %c0_3 = arith.constant 0 : index
    %c0_4 = arith.constant 0 : index
    %9 = vector.load %arg2[%c0_3, %c0_4] : memref<16x32xf32, #tpu.memory_space<vmem>>, vector<16x32xf32>
    %cst_5 = arith.constant dense<0.000000e+00> : vector<16x128xf32>
    %10 = tpu.matmul %9, %0, %cst_5 {dimension_numbers = #tpu.dot_dimension_numbers<[1], [1], [0], [0], [0, 0, 1, 0], [], []>} : vector<16x32xf32>, vector<128x32xf32>, vector<16x128xf32> -> vector<16x128xf32>
    %c0_6 = arith.constant 0 : index
    %c0_7 = arith.constant 0 : index
    %11 = vector.load %arg4[%c0_6, %c0_7] : memref<1x128xf32, #tpu.memory_space<vmem>>, vector<1x128xf32>
    %12 = vector.broadcast %8 : f32 to vector<16x128xf32>
    %13 = arith.mulf %10, %12 : vector<16x128xf32>
    %14 = vector.broadcast %11 : vector<1x128xf32> to vector<16x128xf32>
    %15 = arith.addf %13, %14 : vector<16x128xf32>
    %c0_8 = arith.constant 0 : index
    %c0_9 = arith.constant 0 : index
    %16 = vector.load %arg5[%c0_8, %c0_9] : memref<16x128xf32, #tpu.memory_space<vmem>>, vector<16x128xf32>
    tpu.vector_store %arg5[%c0_8, %c0_9], %15 {strides = array<i32>} : memref<16x128xf32, #tpu.memory_space<vmem>>, vector<16x128xf32>,
    return
  }
  func.func @transform_0(%arg0: i32) -> (i32, i32) {
    %c0_i32 = arith.constant 0 : i32
    %c0_i32_0 = arith.constant 0 : i32
    %c0_i32_1 = arith.constant 0 : i32
    return %c0_i32, %c0_i32_0 : i32, i32
  }
  func.func @transform_1(%arg0: i32) -> (i32, i32) {
    %c0_i32 = arith.constant 0 : i32
    %c0_i32_0 = arith.constant 0 : i32
    return %arg0, %c0_i32 : i32, i32
  }
  func.func @transform_2(%arg0: i32) -> (i32, i32) {
    %c0_i32 = arith.constant 0 : i32
    %c0_i32_0 = arith.constant 0 : i32
    %c0_i32_1 = arith.constant 0 : i32
    return %c0_i32, %c0_i32_0 : i32, i32
  }
  func.func @transform_3(%arg0: i32) -> (i32, i32) {
    %c0_i32 = arith.constant 0 : i32
    %c0_i32_0 = arith.constant 0 : i32
    %c0_i32_1 = arith.constant 0 : i32
    return %c0_i32, %c0_i32_0 : i32, i32
  }
  func.func @transform_4(%arg0: i32) -> (i32, i32) {
    %c0_i32 = arith.constant 0 : i32
    %c0_i32_0 = arith.constant 0 : i32
    return %arg0, %c0_i32 : i32, i32
  }
}

</mosaic_0001>

<bundles_post_ra>
// kernel: encoder_forward.1
= control target key start
LH: loop header
LB: loop body
LE: loop exit
PB: predicated region body
PF: predicated region fallthrough
CT: control target
= control target key end

     0   :  { %vm52_vm0 = vcmask 261120   ;;  %s544_s0 = inlined_call_operand.<no memory space> [shape: f32[1,1], index: 0, kind: input, shape index: {}]   ;;  %s545_s1 = inlined_call_operand.vmem [shape: f32[16,32], index: 1, kind: input, shape index: {}]   ;;  %s546_s2 = inlined_call_operand.vmem [shape: f32[128,32], index: 2, kind: input, shape index: {}]   ;;  %s547_s3 = inlined_call_operand.vmem [shape: f32[1,128], index: 3, kind: input, shape index: {}]   ;;  %s548_s4 = inlined_call_operand.hbm [shape: f32[16,128], index: 4, kind: output, shape index: {}]  }
   0x1   :  { %v392_v0 = vld [vmem:[%s546_s2] sm:$0xff]  ;;  %v397_v1 = vld [vmem:[%s546_s2 + $0x8] sm:$0xff]  ;;  %v402_v2 = vld [vmem:[%s546_s2 + $0x10] sm:$0xff] }
   0x2   :  { %v407_v3 = vld [vmem:[%s546_s2 + $0x18] sm:$0xff]  ;;  %v412_v4 = vld [vmem:[%s546_s2 + $0x20] sm:$0xff]  ;;  %v36_v5 = vmul.f32 %v392_v0, %v392_v0  ;;  %v37_v6 = vmul.f32 %v397_v1, %v397_v1  ;;  %v38_v7 = vmul.f32 %v402_v2, %v402_v2  ;;  %v425_v9 = vld [vmem:[%s546_s2 + $0x28] sm:$0xff] }
   0x3   :  { %v39_v8 = vmul.f32 %v407_v3, %v407_v3  ;;  %v40_v11 = vmul.f32 %v412_v4, %v412_v4  ;;  %v434_v13 = vld [vmem:[%s546_s2 + $0x30] sm:$0xff]  ;;  %v34_v14 = vld [vmem:[%s546_s2 + $0x78] sm:$0xff]  ;;  %v97_v16 = vld [vmem:[%s545_s1] sm:$0xff]  ;;  %v41_v17 = vmul.f32 %v425_v9, %v425_v9 }
   0x4   :  { %v53_v10 = vsel %vm52_vm0, %v36_v5, 0.0  ;;  %v54_v12 = vsel %vm52_vm0, %v37_v6, 0.0  ;;  %v56_v18 = vsel %vm52_vm0, %v38_v7, 0.0  ;;  %295 = vmatprep.subr.msk.mxu0 %vm52_vm0, %v34_v14  ;;  %327 = vmatprep.mubr.msk.f32.mxu0 %vm52_vm0, %v97_v16 }
   0x5   :  { %v55_v15 = vadd.f32 %v54_v12, %v53_v10  ;;  %v58_v19 = vsel %vm52_vm0, %v39_v8, 0.0 }
   0x6   :  { %10 = vsyncpa [#allocation4], 0  ;;  %v26_v20 = vld [vmem:[%s546_s2 + $0x38] sm:$0xff]  ;;  %v33_v21 = vld [vmem:[%s546_s2 + $0x70] sm:$0xff]  ;;  %296 = vmatpush3.xpose.msk.msra.mxu0 %vm52_vm0, %v34_v14  ;;  %v42_v23 = vmul.f32 %v434_v13, %v434_v13  ;;  %v60_v24 = vsel %vm52_vm0, %v40_v11, 0.0  ;;  %v62_v28 = vsel %vm52_vm0, %v41_v17, 0.0  ;;  %v51_v56 = vmul.f32 %v34_v14, %v34_v14 }
   0x7   :  { %v57_v22 = vadd.f32 %v56_v18, %v55_v15  ;;  %297 = vmatprep.subr.msk.mxu0 %vm52_vm0, %v33_v21  ;;  %v27_v25 = vld [vmem:[%s546_s2 + $0x40] sm:$0xff]  ;;  %v43_v27 = vmul.f32 %v26_v20, %v26_v20  ;;  %v28_v29 = vld [vmem:[%s546_s2 + $0x48] sm:$0xff]  ;;  %v29_v34 = vld [vmem:[%s546_s2 + $0x50] sm:$0xff]  ;;  %v50_v53 = vmul.f32 %v33_v21, %v33_v21  ;;  %s361_s28 = smov [#allocation3]  }
   0x8   :  { %v32_v30 = vld [vmem:[%s546_s2 + $0x68] sm:$0xff]  ;;  %v44_v32 = vmul.f32 %v27_v25, %v27_v25  ;;  %v64_v33 = vsel %vm52_vm0, %v42_v23, 0.0  ;;  %v45_v36 = vmul.f32 %v28_v29, %v28_v29  ;;  %v30_v38 = vld [vmem:[%s546_s2 + $0x58] sm:$0xff]  ;;  %v31_v39 = vld [vmem:[%s546_s2 + $0x60] sm:$0xff]  ;;  %v46_v41 = vmul.f32 %v29_v34, %v29_v34  ;;  %s247_s29 = sshll.u32 %s361_s28, 4  ;;  %s248_s29 = int_to_ptr.vmem [resolvable:$true] %s247_s29 }
   0x9   :  { %v59_v26 = vadd.f32 %v58_v19, %v57_v22  ;;  %v66_v37 = vsel %vm52_vm0, %v43_v27, 0.0  ;;  %v47_v44 = vmul.f32 %v30_v38, %v30_v38  ;;  %v48_v47 = vmul.f32 %v31_v39, %v31_v39  ;;  %v276_v11 = vld [vmem:[%s547_s3] ss:$0 sm:$0xff]  ;;  %s339_s6 = scalar_lea.vmem %s248_s29, 256  ;;  %p344_p1 = scmp.lt.s32.totalorder %s248_s29, %s248_s29 }
   0xa   :  { %298 = vmatpush3.xpose.msk.msra.mxu0 %vm52_vm0, %v33_v21  ;;  %v68_v42 = vsel %vm52_vm0, %v44_v32, 0.0  ;;  %v70_v45 = vsel %vm52_vm0, %v45_v36, 0.0  ;;  %v72_v48 = vsel %vm52_vm0, %v46_v41, 0.0  ;;  %v49_v50 = vmul.f32 %v32_v30, %v32_v30  ;;  %p340_p0 = scmp.ne.s32.totalorder %s248_s29, %s339_s6  ;;  %p345_p2 = scmp.lt.s32.totalorder %s339_s6, %s339_s6 }
   0xb   :  { %v61_v31 = vadd.f32 %v60_v24, %v59_v26  ;;  %299 = vmatprep.subr.msk.mxu0 %vm52_vm0, %v32_v30  ;;  %v74_v51 = vsel %vm52_vm0, %v47_v44, 0.0  ;;  %v76_v54 = vsel %vm52_vm0, %v48_v47, 0.0  ;;  %v80_v59 = vsel %vm52_vm0, %v50_v53, 0.0 }
   0xc   :  { %v78_v57 = vsel %vm52_vm0, %v49_v50, 0.0  ;;  %v82_v61 = vsel %vm52_vm0, %v51_v56, 0.0  ;;  %p346_p3 = por %p345_p2, %p344_p1 }
   0xd   :  { %v63_v35 = vadd.f32 %v62_v28, %v61_v31 }
   0xe   :  { %300 = vmatpush3.xpose.msk.msra.mxu0 %vm52_vm0, %v32_v30  ;;  %p347_p4 = pnand %p346_p3, %p340_p0 }
   0xf   :  { %v65_v40 = vadd.f32 %v64_v33, %v63_v35  ;;  %301 = vmatprep.subr.msk.mxu0 %vm52_vm0, %v31_v39 }
  0x11   :  { %v67_v43 = vadd.f32 %v66_v37, %v65_v40 }
  0x12   :  { %302 = vmatpush3.xpose.msk.msra.mxu0 %vm52_vm0, %v31_v39 }
  0x13   :  { %v69_v46 = vadd.f32 %v68_v42, %v67_v43  ;;  %303 = vmatprep.subr.msk.mxu0 %vm52_vm0, %v30_v38 }
  0x15   :  { %v71_v49 = vadd.f32 %v70_v45, %v69_v46 }
  0x16   :  { %304 = vmatpush3.xpose.msk.msra.mxu0 %vm52_vm0, %v30_v38 }
  0x17   :  { %v73_v52 = vadd.f32 %v72_v48, %v71_v49  ;;  %305 = vmatprep.subr.msk.mxu0 %vm52_vm0, %v29_v34 }
  0x19   :  { %v75_v55 = vadd.f32 %v74_v51, %v73_v52 }
  0x1a   :  { %306 = vmatpush3.xpose.msk.msra.mxu0 %vm52_vm0, %v29_v34 }
  0x1b   :  { %v77_v58 = vadd.f32 %v76_v54, %v75_v55  ;;  %307 = vmatprep.subr.msk.mxu0 %vm52_vm0, %v28_v29 }
  0x1d   :  { %v79_v60 = vadd.f32 %v78_v57, %v77_v58 }
  0x1e   :  { %308 = vmatpush3.xpose.msk.msra.mxu0 %vm52_vm0, %v28_v29 }
  0x1f   :  { %v81_v62 = vadd.f32 %v80_v59, %v79_v60  ;;  %309 = vmatprep.subr.msk.mxu0 %vm52_vm0, %v27_v25 }
  0x21   :  { %v83_v63 = vadd.f32 %v82_v61, %v81_v62 }
  0x22   :  { %310 = vmatpush3.xpose.msk.msra.mxu0 %vm52_vm0, %v27_v25 }
  0x23   :  { %84 = vadd.xlane.f32.xlu0 %v83_v63  ;;  %311 = vmatprep.subr.msk.mxu0 %vm52_vm0, %v26_v20 }
  0x26   :  { %312 = vmatpush3.xpose.msk.msra.mxu0 %vm52_vm0, %v26_v20 }
  0x27   :  { %313 = vmatprep.subr.msk.mxu0 %vm52_vm0, %v434_v13 }
  0x2a   :  { %314 = vmatpush3.xpose.msk.msra.mxu0 %vm52_vm0, %v434_v13 }
  0x2b   :  { %315 = vmatprep.subr.msk.mxu0 %vm52_vm0, %v425_v9 }
  0x2e   :  { %316 = vmatpush3.xpose.msk.msra.mxu0 %vm52_vm0, %v425_v9 }
  0x2f   :  { %317 = vmatprep.subr.msk.mxu0 %vm52_vm0, %v412_v4 }
  0x32   :  { %318 = vmatpush3.xpose.msk.msra.mxu0 %vm52_vm0, %v412_v4 }
  0x33   :  { %319 = vmatprep.subr.msk.mxu0 %vm52_vm0, %v407_v3 }
  0x36   :  { %320 = vmatpush3.xpose.msk.msra.mxu0 %vm52_vm0, %v407_v3  ;;  %v98_v3 = vld [vmem:[%s545_s1 + $0x8] sm:$0xff] }
  0x37   :  { %321 = vmatprep.subr.msk.mxu0 %vm52_vm0, %v402_v2 }
  0x3a   :  { %322 = vmatpush3.xpose.msk.msra.mxu0 %vm52_vm0, %v402_v2 }
  0x3b   :  { %323 = vmatprep.subr.msk.mxu0 %vm52_vm0, %v397_v1 }
  0x3e   :  { %324 = vmatpush3.xpose.msk.msra.mxu0 %vm52_vm0, %v397_v1 }
  0x3f   :  { %325 = vmatprep.subr.msk.mxu0 %vm52_vm0, %v392_v0 }
  0x42   :  { %326 = vmatpush3.xpose.msk.msra.mxu0 %vm52_vm0, %v392_v0 }
  0x45   :  { %328 = vmatmul.mubr.msk.f32.vlgmr.msra.gmra.mxu0 %vm52_vm0, %v98_v3 }
  0xac   :  { %v85_v4 = vpop.xlane.xlu0 %84 }
  0xad   :  { %v86_v2 = vrot.slane %v85_v4, 4 }
  0xaf   :  { %v87_v5 = vadd.f32 %v86_v2, %v85_v4 }
  0xb1   :  { %v88_v6 = vrot.slane %v87_v5, 2 }
  0xb3   :  { %v89_v7 = vadd.f32 %v88_v6, %v87_v5 }
  0xb5   :  { %v90_v8 = vrot.slane %v89_v7, 1 }
  0xb7   :  { %v91_v9 = vadd.f32 %v90_v8, %v89_v7 }
  0xb9   :  { %330 = vpush %v91_v9 }
  0xea   :  { %s331_s24 = spop %330 }
  0xeb   :  { %v93_v1 = vstv %s331_s24 }
  0xec   :  { %337 = vrsqrt.f32 %v93_v1 }
  0xf9   :  { %v338_v10 = vpop.eup %337 }
  0xfa   :  { %332 = vpush %v338_v10 }
 0x105   :  { %v329_v0 = vpop.f32.mrf.mxu0 }
 0x107   :  { %v219_v13 = vpop.f32.mrf.mxu0 }
 0x12b   :  { %s333_s25 = spop %332 }
 0x12c   :  { %s96_s1 = smul.f32 %s333_s25, %s544_s0 }
 0x12e   :  { %v229_v12 = vstv %s96_s1 }
 0x12f   :  { %v231_v14 = vmul.f32 %v329_v0, %v229_v12  ;;  %v230_v15 = vmul.f32 %v229_v12, %v219_v13 }
 0x131   :  { %v239_v16 = vadd.f32 %v276_v11, %v231_v14  ;;  %v238_v17 = vadd.f32 %v276_v11, %v230_v15 }
 0x133   :  { %241 = vst [vmem:[#allocation3 + $0x8] sm:$0xff] %v239_v16  ;;  %240 = vst [vmem:[#allocation3] sm:$0xff] %v238_v17 }
 0x134   :  { %350 = shalt.err (!%p347_p4)
}
 0x135   :  { %s362_s0 = smov 128   ;;  %s363_s7 = smov 8  }
 0x136   :  { %253 = dma.vmem_to_hbm [thread:$0]  %s248_s29, 256, %s548_s4, [#allocation4], %s362_s0, %s362_s0, %s363_s7  }
 0x137   :  { %359 = dma.done.wait [#allocation4], 256  }
 0x138   :  { %360 = vsyncadd [#allocation4], 4294967040 }
 0x139   :  { %257 = vsyncpa [#allocation4], 1 }

</bundles_post_ra>
